<compile_context>
chip_gen: v6e
topology: v6e:2x2x1
jax: 0.10.0
libtpu: 0.0.40
codegen_flags: <defaults>
</compile_context>

<pallas_src>
import functools

import jax
import jax.numpy as jnp
from jax.experimental import pallas as pl
from jax.experimental.pallas import tpu as pltpu


def _depth_conv_kernel(x_ref, wdw_ref, bdw_ref, wpw_ref, bpw_ref, o_ref, *,
                       kernel_size, stride, w_row, out_lanes):
    """One (batch, row-tile) step of fused depthwise->ReLU->1x1->ReLU.

    x_ref  : (1, 1, s*s, C, in_lanes)  phase-split, row-tiled, zero-padded input;
                                       rows flattened on lanes with pitch w_row
    wdw_ref: (C, K*K)   depthwise weights (f32)
    bdw_ref: (C, 1)     depthwise bias (f32)
    wpw_ref: (OC, C)    pointwise (1x1) weights (f32)
    bpw_ref: (OC, 1)    pointwise bias (f32)
    o_ref  : (1, OC, out_lanes)  output tile (Rt rows flattened on lanes)
    """
    K, s = kernel_size, stride
    C = x_ref.shape[3]

    wdw = wdw_ref[...]                                    # (C, K*K) f32
    acc = jnp.zeros((C, out_lanes), dtype=jnp.float32)

    for dy in range(K):
        ph_h, oh = dy % s, dy // s
        for dx in range(K):
            ph_w, ow = dx % s, dx // s
            phase = ph_h * s + ph_w
            start = oh * w_row + ow                       # static; row part 128-aligned
            win = x_ref[0, 0, phase, :, start:start + out_lanes].astype(jnp.float32)
            tap = dy * K + dx
            acc = acc + win * wdw[:, tap:tap + 1]         # per-channel lane broadcast

    acc = jnp.maximum(acc + bdw_ref[...], 0.0)            # depthwise bias + ReLU

    # 1x1 conv on the MXU: bf16 operands, f32 accumulation; bias + ReLU fused.
    y = jnp.dot(wpw_ref[...].astype(jnp.bfloat16), acc.astype(jnp.bfloat16),
                preferred_element_type=jnp.float32)       # (OC, out_lanes)
    y = jnp.maximum(y + bpw_ref[...], 0.0)
    o_ref[0] = y.astype(o_ref.dtype)


def depth_conv(x, w_dw, b_dw, w_pw, b_pw, *, stride=1):
    """DepthConv forward: NCHW input, PyTorch Conv2d weight layouts.

    x    : (N, C, H, W)
    w_dw : (C, 1, K, K)   depthwise conv weight (groups=C)
    b_dw : (C,)           depthwise conv bias
    w_pw : (OC, C, 1, 1)  pointwise conv weight
    b_pw : (OC,)          pointwise conv bias
    """
    assert stride in (1, 2), "stride should be in [1, 2]"
    N, C, H, W = x.shape
    OC = w_pw.shape[0]
    K = w_dw.shape[-1]
    pad = K // 2
    s = stride
    lane = 128

    H_pad, W_pad = H + 2 * pad, W + 2 * pad
    H_out = (H_pad - K) // s + 1
    W_out = (W_pad - K) // s + 1
    oh_max = (K - 1) // s                         # max intra-phase row offset

    PH = s * s
    H_ph = -(-H_pad // s)                         # padded rows per phase
    W_ph = -(-W_pad // s)                         # padded cols per phase
    w_row = -(-W_ph // lane) * lane               # lane-aligned row pitch

    Rt = max(1, min(H_out, max(1, 1024 // w_row)))  # output rows per grid step
    T = -(-H_out // Rt)                             # number of row tiles
    rows_total = max(H_ph, T * Rt + oh_max)
    rows_tile = Rt + oh_max                         # tile rows incl. halo
    out_lanes = Rt * w_row
    in_lanes = rows_tile * w_row + lane             # +lane: slack for the dx offset

    # ---- input prep (one XLA fusion): pad -> phase split -> row tiles w/ halo.
    x_sp = jnp.pad(x, ((0, 0), (0, 0), (pad, pad), (pad, pad)))
    x_sp = jnp.pad(x_sp, ((0, 0), (0, 0),
                          (0, H_ph * s - H_pad), (0, W_ph * s - W_pad)))
    x_ph = x_sp.reshape(N, C, H_ph, s, W_ph, s).transpose(0, 3, 5, 1, 2, 4)
    x_ph = x_ph.reshape(N, PH, C, H_ph, W_ph)
    x_ph = jnp.pad(x_ph, ((0, 0), (0, 0), (0, 0),
                          (0, rows_total - H_ph), (0, w_row - W_ph)))
    tiles = [x_ph[:, :, :, t * Rt:t * Rt + rows_tile, :] for t in range(T)]
    x_t = jnp.stack(tiles, axis=1).reshape(N, T, PH, C, rows_tile * w_row)
    x_t = jnp.pad(x_t, ((0, 0), (0, 0), (0, 0), (0, 0), (0, lane)))

    # ---- parameters stay f32 (do NOT downcast to the activation dtype).
    wdw2 = w_dw.reshape(C, K * K).astype(jnp.float32)
    bdw2 = b_dw.reshape(C, 1).astype(jnp.float32)
    wpw2 = w_pw.reshape(OC, C).astype(jnp.float32)
    bpw2 = b_pw.reshape(OC, 1).astype(jnp.float32)

    kern = functools.partial(_depth_conv_kernel, kernel_size=K, stride=s,
                             w_row=w_row, out_lanes=out_lanes)

    # ---- explicit VMEM budget (double-buffered blocks + f32/bf16 temps + slack).
    itemsize = jnp.dtype(x.dtype).itemsize
    blk_in = PH * C * in_lanes * itemsize
    blk_out = OC * out_lanes * itemsize
    tmp = (C + OC) * out_lanes * 6
    vmem_limit = int(min(64 * 2 ** 20,
                         max(16 * 2 ** 20, 2 * (blk_in + blk_out) + tmp + (1 << 20))))

    out = pl.pallas_call(
        kern,
        out_shape=jax.ShapeDtypeStruct((N, OC, T * out_lanes), x.dtype),
        grid_spec=pl.GridSpec(
            grid=(N, T),
            in_specs=[
                pl.BlockSpec((1, 1, PH, C, in_lanes),
                             lambda n, t: (n, t, 0, 0, 0)),
                pl.BlockSpec((C, K * K), lambda n, t: (0, 0)),
                pl.BlockSpec((C, 1), lambda n, t: (0, 0)),
                pl.BlockSpec((OC, C), lambda n, t: (0, 0)),
                pl.BlockSpec((OC, 1), lambda n, t: (0, 0)),
            ],
            out_specs=pl.BlockSpec((1, OC, out_lanes), lambda n, t: (n, 0, t)),
        ),
        compiler_params=pltpu.CompilerParams(
            dimension_semantics=("parallel", "parallel"),
            vmem_limit_bytes=vmem_limit),
    )(x_t, wdw2, bdw2, wpw2, bpw2)

    # Cheap final crop: (N, OC, T*Rt, w_row) -> (N, OC, H_out, W_out).
    # Lanes >= W_out of each row (and rows >= H_out) hold unused tap overrun.
    out = out.reshape(N, OC, T * Rt, w_row)[:, :, :H_out, :W_out]
    return out


def depth_conv_ref(x, w_dw, b_dw, w_pw, b_pw, *, stride=1):
    """Pure-JAX reference matching the PyTorch DepthConv module."""
    K = w_dw.shape[-1]
    pad = K // 2
    y = jax.lax.conv_general_dilated(
        x, w_dw, window_strides=(stride, stride),
        padding=((pad, pad), (pad, pad)),
        dimension_numbers=("NCHW", "OIHW", "NCHW"),
        feature_group_count=x.shape[1],
        precision=jax.lax.Precision.HIGHEST)
    y = jnp.maximum(y + b_dw.reshape(1, -1, 1, 1), 0.0)
    z = jax.lax.conv_general_dilated(
        y, w_pw, window_strides=(1, 1), padding="VALID",
        dimension_numbers=("NCHW", "OIHW", "NCHW"),
        precision=jax.lax.Precision.HIGHEST)
    z = jnp.maximum(z + b_pw.reshape(1, -1, 1, 1), 0.0)
    return z


if __name__ == "__main__":
    key = jax.random.PRNGKey(0)
    k1, k2, k3, k4, k5 = jax.random.split(key, 5)

    N, C, H, W = 2, 4, 16, 16
    OC, K = 8, 3

    x = jax.random.normal(k1, (N, C, H, W), dtype=jnp.float32)
    w_dw = jax.random.normal(k2, (C, 1, K, K), dtype=jnp.float32) * 0.25
    b_dw = jax.random.normal(k3, (C,), dtype=jnp.float32) * 0.1
    w_pw = jax.random.normal(k4, (OC, C, 1, 1), dtype=jnp.float32) * 0.2
    b_pw = jax.random.normal(k5, (OC,), dtype=jnp.float32) * 0.1

    # stride = 1
    y1 = jax.block_until_ready(depth_conv(x, w_dw, b_dw, w_pw, b_pw, stride=1))
    y1_ref = depth_conv_ref(x, w_dw, b_dw, w_pw, b_pw, stride=1)
    assert y1.shape == y1_ref.shape == (N, OC, H, W)
    assert jnp.allclose(y1, y1_ref, atol=5e-2, rtol=5e-2), "stride=1 mismatch"

    # stride = 2 (handled in-kernel via the phase-split layout)
    y2 = jax.block_until_ready(depth_conv(x, w_dw, b_dw, w_pw, b_pw, stride=2))
    y2_ref = depth_conv_ref(x, w_dw, b_dw, w_pw, b_pw, stride=2)
    assert y2.shape == y2_ref.shape
    assert jnp.allclose(y2, y2_ref, atol=5e-2, rtol=5e-2), "stride=2 mismatch"

    print("KERNEL_OK")
</pallas_src>

<mosaic_0001>
module attributes {stable_mosaic.version = 11 : i64} {
  func.func @_depth_conv_kernel(%arg0: i32, %arg1: i32, %arg2: memref<1x1x1x4x1408xf32, #tpu.memory_space<vmem>>, %arg3: memref<4x9xf32, #tpu.memory_space<vmem>>, %arg4: memref<4x1xf32, #tpu.memory_space<vmem>>, %arg5: memref<8x4xf32, #tpu.memory_space<vmem>>, %arg6: memref<8x1xf32, #tpu.memory_space<vmem>>, %arg7: memref<1x8x1024xf32, #tpu.memory_space<vmem>>) attributes {dimension_semantics = [#tpu.dimension_semantics<parallel>, #tpu.dimension_semantics<parallel>], iteration_bounds = array<i64: 2, 2>, scalar_prefetch = 0 : i64, scratch_operands = 0 : i64, tpu.core_type = #tpu.core_type<tc>, window_params = [{transform_indices = @transform_0, window_bounds = array<i64: 1, 1, 1, 4, 1408>}, {pipeline_mode = #tpu.pipeline_mode<synchronous>, transform_indices = @transform_1, window_bounds = array<i64: 4, 9>}, {pipeline_mode = #tpu.pipeline_mode<synchronous>, transform_indices = @transform_2, window_bounds = array<i64: 4, 1>}, {pipeline_mode = #tpu.pipeline_mode<synchronous>, transform_indices = @transform_3, window_bounds = array<i64: 8, 4>}, {pipeline_mode = #tpu.pipeline_mode<synchronous>, transform_indices = @transform_4, window_bounds = array<i64: 8, 1>}, {transform_indices = @transform_5, window_bounds = array<i64: 1, 8, 1024>}]} {
    %c0 = arith.constant 0 : index
    %c0_0 = arith.constant 0 : index
    %0 = vector.load %arg3[%c0, %c0_0] : memref<4x9xf32, #tpu.memory_space<vmem>>, vector<4x9xf32>
    %cst = arith.constant 0.000000e+00 : f32
    %1 = vector.broadcast %cst : f32 to vector<4x1024xf32>
    %c0_1 = arith.constant 0 : index
    %c0_2 = arith.constant 0 : index
    %c0_3 = arith.constant 0 : index
    %c0_4 = arith.constant 0 : index
    %c0_5 = arith.constant 0 : index
    %2 = vector.load %arg2[%c0_1, %c0_2, %c0_3, %c0_4, %c0_5] : memref<1x1x1x4x1408xf32, #tpu.memory_space<vmem>>, vector<1x1x1x4x1024xf32>
    %3 = vector.shape_cast %2 : vector<1x1x1x4x1024xf32> to vector<4x1024xf32>
    %4 = vector.extract_strided_slice %0 {offsets = [0, 0], sizes = [4, 1], strides = [1, 1]} : vector<4x9xf32> to vector<4x1xf32>
    %5 = vector.broadcast %4 : vector<4x1xf32> to vector<4x1024xf32>
    %6 = arith.mulf %3, %5 : vector<4x1024xf32>
    %7 = arith.addf %1, %6 : vector<4x1024xf32>
    %c0_6 = arith.constant 0 : index
    %c0_7 = arith.constant 0 : index
    %c0_8 = arith.constant 0 : index
    %c0_9 = arith.constant 0 : index
    %c1 = arith.constant 1 : index
    %8 = vector.load %arg2[%c0_6, %c0_7, %c0_8, %c0_9, %c1] : memref<1x1x1x4x1408xf32, #tpu.memory_space<vmem>>, vector<1x1x1x4x1024xf32>
    %9 = vector.shape_cast %8 : vector<1x1x1x4x1024xf32> to vector<4x1024xf32>
    %10 = vector.extract_strided_slice %0 {offsets = [0, 1], sizes = [4, 1], strides = [1, 1]} : vector<4x9xf32> to vector<4x1xf32>
    %11 = vector.broadcast %10 : vector<4x1xf32> to vector<4x1024xf32>
    %12 = arith.mulf %9, %11 : vector<4x1024xf32>
    %13 = arith.addf %7, %12 : vector<4x1024xf32>
    %c0_10 = arith.constant 0 : index
    %c0_11 = arith.constant 0 : index
    %c0_12 = arith.constant 0 : index
    %c0_13 = arith.constant 0 : index
    %c2 = arith.constant 2 : index
    %14 = vector.load %arg2[%c0_10, %c0_11, %c0_12, %c0_13, %c2] : memref<1x1x1x4x1408xf32, #tpu.memory_space<vmem>>, vector<1x1x1x4x1024xf32>
    %15 = vector.shape_cast %14 : vector<1x1x1x4x1024xf32> to vector<4x1024xf32>
    %16 = vector.extract_strided_slice %0 {offsets = [0, 2], sizes = [4, 1], strides = [1, 1]} : vector<4x9xf32> to vector<4x1xf32>
    %17 = vector.broadcast %16 : vector<4x1xf32> to vector<4x1024xf32>
    %18 = arith.mulf %15, %17 : vector<4x1024xf32>
    %19 = arith.addf %13, %18 : vector<4x1024xf32>
    %c0_14 = arith.constant 0 : index
    %c0_15 = arith.constant 0 : index
    %c0_16 = arith.constant 0 : index
    %c0_17 = arith.constant 0 : index
    %c128 = arith.constant 128 : index
    %20 = vector.load %arg2[%c0_14, %c0_15, %c0_16, %c0_17, %c128] : memref<1x1x1x4x1408xf32, #tpu.memory_space<vmem>>, vector<1x1x1x4x1024xf32>
    %21 = vector.shape_cast %20 : vector<1x1x1x4x1024xf32> to vector<4x1024xf32>
    %22 = vector.extract_strided_slice %0 {offsets = [0, 3], sizes = [4, 1], strides = [1, 1]} : vector<4x9xf32> to vector<4x1xf32>
    %23 = vector.broadcast %22 : vector<4x1xf32> to vector<4x1024xf32>
    %24 = arith.mulf %21, %23 : vector<4x1024xf32>
    %25 = arith.addf %19, %24 : vector<4x1024xf32>
    %c0_18 = arith.constant 0 : index
    %c0_19 = arith.constant 0 : index
    %c0_20 = arith.constant 0 : index
    %c0_21 = arith.constant 0 : index
    %c129 = arith.constant 129 : index
    %26 = vector.load %arg2[%c0_18, %c0_19, %c0_20, %c0_21, %c129] : memref<1x1x1x4x1408xf32, #tpu.memory_space<vmem>>, vector<1x1x1x4x1024xf32>
    %27 = vector.shape_cast %26 : vector<1x1x1x4x1024xf32> to vector<4x1024xf32>
    %28 = vector.extract_strided_slice %0 {offsets = [0, 4], sizes = [4, 1], strides = [1, 1]} : vector<4x9xf32> to vector<4x1xf32>
    %29 = vector.broadcast %28 : vector<4x1xf32> to vector<4x1024xf32>
    %30 = arith.mulf %27, %29 : vector<4x1024xf32>
    %31 = arith.addf %25, %30 : vector<4x1024xf32>
    %c0_22 = arith.constant 0 : index
    %c0_23 = arith.constant 0 : index
    %c0_24 = arith.constant 0 : index
    %c0_25 = arith.constant 0 : index
    %c130 = arith.constant 130 : index
    %32 = vector.load %arg2[%c0_22, %c0_23, %c0_24, %c0_25, %c130] : memref<1x1x1x4x1408xf32, #tpu.memory_space<vmem>>, vector<1x1x1x4x1024xf32>
    %33 = vector.shape_cast %32 : vector<1x1x1x4x1024xf32> to vector<4x1024xf32>
    %34 = vector.extract_strided_slice %0 {offsets = [0, 5], sizes = [4, 1], strides = [1, 1]} : vector<4x9xf32> to vector<4x1xf32>
    %35 = vector.broadcast %34 : vector<4x1xf32> to vector<4x1024xf32>
    %36 = arith.mulf %33, %35 : vector<4x1024xf32>
    %37 = arith.addf %31, %36 : vector<4x1024xf32>
    %c0_26 = arith.constant 0 : index
    %c0_27 = arith.constant 0 : index
    %c0_28 = arith.constant 0 : index
    %c0_29 = arith.constant 0 : index
    %c256 = arith.constant 256 : index
    %38 = vector.load %arg2[%c0_26, %c0_27, %c0_28, %c0_29, %c256] : memref<1x1x1x4x1408xf32, #tpu.memory_space<vmem>>, vector<1x1x1x4x1024xf32>
    %39 = vector.shape_cast %38 : vector<1x1x1x4x1024xf32> to vector<4x1024xf32>
    %40 = vector.extract_strided_slice %0 {offsets = [0, 6], sizes = [4, 1], strides = [1, 1]} : vector<4x9xf32> to vector<4x1xf32>
    %41 = vector.broadcast %40 : vector<4x1xf32> to vector<4x1024xf32>
    %42 = arith.mulf %39, %41 : vector<4x1024xf32>
    %43 = arith.addf %37, %42 : vector<4x1024xf32>
    %c0_30 = arith.constant 0 : index
    %c0_31 = arith.constant 0 : index
    %c0_32 = arith.constant 0 : index
    %c0_33 = arith.constant 0 : index
    %c257 = arith.constant 257 : index
    %44 = vector.load %arg2[%c0_30, %c0_31, %c0_32, %c0_33, %c257] : memref<1x1x1x4x1408xf32, #tpu.memory_space<vmem>>, vector<1x1x1x4x1024xf32>
    %45 = vector.shape_cast %44 : vector<1x1x1x4x1024xf32> to vector<4x1024xf32>
    %46 = vector.extract_strided_slice %0 {offsets = [0, 7], sizes = [4, 1], strides = [1, 1]} : vector<4x9xf32> to vector<4x1xf32>
    %47 = vector.broadcast %46 : vector<4x1xf32> to vector<4x1024xf32>
    %48 = arith.mulf %45, %47 : vector<4x1024xf32>
    %49 = arith.addf %43, %48 : vector<4x1024xf32>
    %c0_34 = arith.constant 0 : index
    %c0_35 = arith.constant 0 : index
    %c0_36 = arith.constant 0 : index
    %c0_37 = arith.constant 0 : index
    %c258 = arith.constant 258 : index
    %50 = vector.load %arg2[%c0_34, %c0_35, %c0_36, %c0_37, %c258] : memref<1x1x1x4x1408xf32, #tpu.memory_space<vmem>>, vector<1x1x1x4x1024xf32>
    %51 = vector.shape_cast %50 : vector<1x1x1x4x1024xf32> to vector<4x1024xf32>
    %52 = vector.extract_strided_slice %0 {offsets = [0, 8], sizes = [4, 1], strides = [1, 1]} : vector<4x9xf32> to vector<4x1xf32>
    %53 = vector.broadcast %52 : vector<4x1xf32> to vector<4x1024xf32>
    %54 = arith.mulf %51, %53 : vector<4x1024xf32>
    %55 = arith.addf %49, %54 : vector<4x1024xf32>
    %c0_38 = arith.constant 0 : index
    %c0_39 = arith.constant 0 : index
    %56 = vector.load %arg4[%c0_38, %c0_39] : memref<4x1xf32, #tpu.memory_space<vmem>>, vector<4x1xf32>
    %57 = vector.broadcast %56 : vector<4x1xf32> to vector<4x1024xf32>
    %58 = arith.addf %55, %57 : vector<4x1024xf32>
    %cst_40 = arith.constant 0.000000e+00 : f32
    %59 = vector.broadcast %cst_40 : f32 to vector<4x1024xf32>
    %60 = arith.maximumf %58, %59 : vector<4x1024xf32>
    %c0_41 = arith.constant 0 : index
    %c0_42 = arith.constant 0 : index
    %61 = vector.load %arg5[%c0_41, %c0_42] : memref<8x4xf32, #tpu.memory_space<vmem>>, vector<8x4xf32>
    %62 = arith.truncf %61 : vector<8x4xf32> to vector<8x4xbf16>
    %63 = arith.truncf %60 : vector<4x1024xf32> to vector<4x1024xbf16>
    %cst_43 = arith.constant dense<0.000000e+00> : vector<8x1024xf32>
    %64 = tpu.matmul %62, %63, %cst_43 {dimension_numbers = #tpu.dot_dimension_numbers<[1], [0], [0], [1], [0, 0, 1, 1], [], []>} : vector<8x4xbf16>, vector<4x1024xbf16>, vector<8x1024xf32> -> vector<8x1024xf32>
    %c0_44 = arith.constant 0 : index
    %c0_45 = arith.constant 0 : index
    %65 = vector.load %arg6[%c0_44, %c0_45] : memref<8x1xf32, #tpu.memory_space<vmem>>, vector<8x1xf32>
    %66 = vector.broadcast %65 : vector<8x1xf32> to vector<8x1024xf32>
    %67 = arith.addf %64, %66 : vector<8x1024xf32>
    %cst_46 = arith.constant 0.000000e+00 : f32
    %68 = vector.broadcast %cst_46 : f32 to vector<8x1024xf32>
    %69 = arith.maximumf %67, %68 : vector<8x1024xf32>
    %c0_47 = arith.constant 0 : index
    %c0_48 = arith.constant 0 : index
    %c0_49 = arith.constant 0 : index
    %70 = vector.load %arg7[%c0_47, %c0_48, %c0_49] : memref<1x8x1024xf32, #tpu.memory_space<vmem>>, vector<1x8x1024xf32>
    %71 = vector.shape_cast %70 : vector<1x8x1024xf32> to vector<8x1024xf32>
    %72 = vector.shape_cast %69 : vector<8x1024xf32> to vector<1x8x1024xf32>
    tpu.vector_store %arg7[%c0_47, %c0_48, %c0_49], %72 {strides = array<i32>} : memref<1x8x1024xf32, #tpu.memory_space<vmem>>, vector<1x8x1024xf32>,
    return
  }
  func.func @transform_0(%arg0: i32, %arg1: i32) -> (i32, i32, i32, i32, i32) {
    %c0_i32 = arith.constant 0 : i32
    %c0_i32_0 = arith.constant 0 : i32
    %c0_i32_1 = arith.constant 0 : i32
    %c0_i32_2 = arith.constant 0 : i32
    return %arg0, %arg1, %c0_i32, %c0_i32_0, %c0_i32_1 : i32, i32, i32, i32, i32
  }
  func.func @transform_1(%arg0: i32, %arg1: i32) -> (i32, i32) {
    %c0_i32 = arith.constant 0 : i32
    %c0_i32_0 = arith.constant 0 : i32
    %c0_i32_1 = arith.constant 0 : i32
    return %c0_i32, %c0_i32_0 : i32, i32
  }
  func.func @transform_2(%arg0: i32, %arg1: i32) -> (i32, i32) {
    %c0_i32 = arith.constant 0 : i32
    %c0_i32_0 = arith.constant 0 : i32
    %c0_i32_1 = arith.constant 0 : i32
    return %c0_i32, %c0_i32_0 : i32, i32
  }
  func.func @transform_3(%arg0: i32, %arg1: i32) -> (i32, i32) {
    %c0_i32 = arith.constant 0 : i32
    %c0_i32_0 = arith.constant 0 : i32
    %c0_i32_1 = arith.constant 0 : i32
    return %c0_i32, %c0_i32_0 : i32, i32
  }
  func.func @transform_4(%arg0: i32, %arg1: i32) -> (i32, i32) {
    %c0_i32 = arith.constant 0 : i32
    %c0_i32_0 = arith.constant 0 : i32
    %c0_i32_1 = arith.constant 0 : i32
    return %c0_i32, %c0_i32_0 : i32, i32
  }
  func.func @transform_5(%arg0: i32, %arg1: i32) -> (i32, i32, i32) {
    %c0_i32 = arith.constant 0 : i32
    %c0_i32_0 = arith.constant 0 : i32
    return %arg0, %c0_i32, %arg1 : i32, i32, i32
  }
}

</mosaic_0001>

<bundles_post_ra>
// kernel: tpu_custom_call.1
= control target key start
LH: loop header
LB: loop body
LE: loop exit
PB: predicated region body
PF: predicated region fallthrough
CT: control target
= control target key end

     0   :  { %10 = vsyncpa [#allocation3], 0  ;;  %s1709_s0 = inlined_call_operand.hbm [shape: f32[2,2,1,4,1408], index: 0, kind: input, shape index: {}]   ;;  %s1710_s1 = inlined_call_operand.vmem [shape: f32[4,9], index: 1, kind: input, shape index: {}]   ;;  %s1711_s2 = inlined_call_operand.vmem [shape: f32[4,1], index: 2, kind: input, shape index: {}]   ;;  %s1712_s3 = inlined_call_operand.vmem [shape: f32[8,4], index: 3, kind: input, shape index: {}]   ;;  %s1713_s4 = inlined_call_operand.vmem [shape: f32[8,1], index: 4, kind: input, shape index: {}]   ;;  %s1714_s5 = inlined_call_operand.hbm [shape: f32[2,8,2048], index: 5, kind: output, shape index: {}]  }
   0x1   :  { %12 = vsyncpa [#allocation3 + $0x1], 0 }
   0x2   :  { %13 = vsyncpa [#allocation4], 0 }
   0x3   :  { %15 = vsyncpa [#allocation4 + $0x1], 0  ;;  %s1320_s18 = smov 0   ;;  %s1322_s19 = smov 0  }
   0x4   :  { %s1324_s20 = smov 0   ;;  %s1326_s21 = smov 0  }
   0x5   :  { %s1328_s22 = smov 0   ;;  %s1330_s23 = smov 0  }
   0x6   :  { %s1332_s24 = smov 0   ;;  %s1334_s25 = smov 0  }
   0x7 LB: > { %1719 = sst [smem:[#allocation8_spill]] %s1266_s23  ;;  %s1024_s26 = sadd.s32 4294967295, %s1274_s25   ;;  %s1274_s25 = sphi %s1334_s25, %s21_s25   ;;  %s1270_s24 = sphi %s1332_s24, %s1734_s24   ;;  %s1266_s23 = sphi %s1330_s23, %s1733_s23   ;;  %s1262_s22 = sphi %s1328_s22, %s1732_s22   ;;  %s1258_s21 = sphi %s1326_s21, %s1731_s21   ;;  %s1254_s20 = sphi %s1324_s20, %s1737_s20   ;;  %s1250_s19 = sphi %s1322_s19, %s1736_s19   ;;  %s1246_s18 = sphi %s1320_s18, %s1735_s18  }
   0x8   : > { %1720 = sst [smem:[#allocation9_spill]] %s1270_s24  ;;  %s1025_s27 = sadd.s32 4294967294, %s1274_s25  }
   0x9   : > { %s30_s28 = sadd.s32 1, %s1266_s23  ;;  %s33_s29 = sadd.s32 1, %s1270_s24 }
   0xa   : > { %p31_p0 = scmp.ge.s32.totalorder %s30_s28, 2  ;;  %s42_s30 = sadd.s32 1, %s1254_s20 }
   0xb   : > { %p49_p1 = scmp.ne.s32.totalorder %s1254_s20, %s1250_s19  ;;  %p50_p2 = scmp.eq.s32.totalorder %s1274_s25, 0 }
   0xc   : > { %s1739_s28 = smov (%p31_p0, %s30_s28), 0  ;;  %s1741_s29 = smov (!%p31_p0, %s33_s29), %s1270_s24 }
   0xd   : > { %1721 = sst [smem:[#allocation10_spill]] %s1739_s28  ;;  %s38_s6 = ssub.s32 %s1266_s23, %s1739_s28 }
   0xe   : > { %p1373_p3 = por %p50_p2, %p49_p1  ;;  %p35_p4 = scmp.ge.s32.totalorder %s1741_s29, 2 }
   0xf   : > { %p55_p5 = scmp.ne.s32.totalorder %s1250_s19, %s1246_s18  ;;  %p56_p6 = scmp.eq.s32.totalorder %s1024_s26, 0 }
  0x10   : > { %p165_p7 = scmp.eq.s32.totalorder %s1024_s26, 3  ;;  %s1743_s29 = smov (%p35_p4, %s1741_s29), 0 }
  0x11   : > { %1723 = sst [smem:[#allocation11_spill]] %s1743_s29  ;;  %p1381_p8 = por %p56_p6, %p55_p5 }
  0x12   : > { %p1385_p9 = por %p165_p7, %p49_p1  ;;  %s37_s10 = ssub.s32 %s1270_s24, %s1743_s29 }
  0x13   : > { %p171_p10 = scmp.eq.s32.totalorder %s1025_s27, 3  ;;  %s39_s11 = sor.u32 %s38_s6, %s37_s10 }
  0x14   : > { %p40_p11 = scmp.eq.s32.totalorder %s39_s11, 0  ;;  %p1061_p13 = scmp.lt.s32.totalorder %s1274_s25, 4 }
  0x15   : > { %p1391_p12 = por %p171_p10, %p55_p5  ;;  %s203_s13 = sand.u32 1, %s1254_s20  }
  0x16   : > { %s1398_s14 = scalar_select %p40_p11, %s1254_s20, %s42_s30  }
  0x17   : > { %s1726_s12 = scalar_select %p1391_p12, 1, 0 }
  0x18   : > { %1727 = sst [smem:[#allocation12_spill]] %s1398_s14  ;;  %s1045_s15 = smul.u32 44, %s203_s13 }
  0x19   : > { %s1046_s16 = smul.u32 11, %s1266_s23  ;;  %p1403_p0 = pnand %p1061_p13, %p1373_p3 }
  0x1a   : > { %s1047_s26 = smul.u32 22, %s1270_s24  ;;  %s207_s27 = scalar_lea.vmem [#allocation2], %s1045_s15 }
  0x1b   : > { %s217_s6 = sshll.u32 %s207_s27, 4  ;;  %p1029_p1 = scmp.ge.s32.totalorder %s1274_s25, 1  ;;  %s218_s6 = int_to_ptr.vmem [resolvable:$true] %s217_s6 }
  0x1c   : > { %s213_s10 = sadd.s32 %s1047_s26, %s1046_s16  ;;  %p222_p2 = scmp.lt.s32.totalorder %s1274_s25, 5 }
  0x1d   : > { %s1028_s11 = sshll.u32 %s213_s10, 6  ;;  %s204_s14 = scalar_lea.sflag [#allocation3], %s203_s13 }
  0x1e   : > { %s215_s30 = scalar_lea.hbm %s1709_s0, %s1028_s11  ;;  %p1152_p4 = pneg %p1403_p0 }
  0x1f   : > { %s1163_s7 = scalar_lea.vmem %s218_s6, 704  ;;  %s1276_s23 = smov [#allocation2]  }
  0x20   : > { %p1164_p3 = scmp.ne.s32.totalorder %s218_s6, %s1163_s7  ;;  %s1168_s24 = sshll.u32 %s1276_s23, 4  ;;  %s1169_s24 = int_to_ptr.vmem [resolvable:$false] %s1168_s24 }
  0x21   : > { %s1170_s15 = scalar_lea.vmem %s1169_s24, 1408  ;;  %p1171_p7 = scmp.lt.s32.totalorder %s218_s6, %s1169_s24 }
  0x22   : > { %p1166_p5 = pnand %p1164_p3, %p1152_p4  ;;  %p1172_p10 = scmp.lt.s32.totalorder %s1170_s15, %s1163_s7 }
  0x24   : > { %p1167_p6 = pneg %p1166_p5  ;;  %p1173_p11 = por %p1172_p10, %p1171_p7 }
  0x26   : > { %p1174_p13 = pnand %p1173_p11, %p1167_p6 }
  0x28   : > { %1177 = shalt.err (!%p1174_p13)
}
  0x29   : > { %1056 = dma.hbm_to_vmem [thread:$0]  (!%p1403_p0), %s215_s30, 704, %s218_s6, %s204_s14  }
  0x2a   : > { %p223_p12 = pnand %p1029_p1, %p222_p2 }
  0x2b   : > { %s1422_s28 = sand.u32 (!%p223_p12), 1, %s1250_s19  }
  0x2c   : > { %226 = sbr.rel (%p223_p12) target bundleno = 583 (0x247), region = 40  ;;  %s229_s24 = scalar_lea.sflag (!%p223_p12), [#allocation3], %s1422_s28 }
  0x2d   : > { %s1048_s23 = smul.u32 (!%p223_p12), 44, %s1422_s28 }
  0x2f   : > { %s1426_s29 = scalar_lea.vmem (!%p223_p12), [#allocation2], %s1048_s23 }
  0x31   : > { %1237 = dma.done.wait (%p1381_p8), %s229_s24, 704  }
  0x32   : > { %1239 = vsyncadd (%p1381_p8), %s229_s24, 4294966592  ;;  %v1277_v0 = vmov 1   ;;  %v1278_v1 = vmov 4   ;;  %v1279_v2 = vmov 0   ;;  %v261_v3 = vld [vmem:[%s1710_s1] sm:$0xf]  ;;  %v273_v13 = vlaneseq }
  0x33   : > { %1139 = vset.pattern.permute.xlu0 %v1277_v0  ;;  %1141 = vset.pattern.permute.xlu1 %v1278_v1  ;;  %v1280_v4 = vmov 2   ;;  %v1281_v5 = vmov 5   ;;  %v1282_v6 = vmov 7   ;;  %v1283_v7 = vmov 8   ;;  %v662_v10 = vld [vmem:[%s1711_s2] sm:$0xf] }
  0x34   : > { %772 = vmatprep.mubr.bf16.mxu0 %v1279_v2  ;;  %813 = vmatprep.mubr.bf16.mxu1 %v1279_v2  ;;  %v1284_v8 = vmov 6   ;;  %v1285_v9 = vmov 3   ;;  %v1286_v11 = vmov 839922192   ;;  %v274_v15 = vshrl.u32 %v273_v13, 7  ;;  %v1446_v18 = vld [vmem:[%s1426_s29 + $0x8] sm:$0xff] }
  0x35   : > { %292 = vperm.xlu0 %1139, %v261_v3   ;;  %427 = vperm.xlu1 %1141, %v261_v3   ;;  %v271_v12 = vunpack.c.l.s4 %v1286_v11  ;;  %v286_v19 = vld [vmem:[%s1426_s29] sm:$0xff]  ;;  %v1452_v24 = vld [vmem:[%s1426_s29 + $0x10] sm:$0xff]  ;;  %s1287_s17 = smov 127   ;;  %s1288_s26 = smov 126   ;;  %v289_v47 = vld [vmem:[%s1426_s29 + $0x18] sm:$0xff]  ;;  %vm327_vm0 = vcmask 1043456  }
  0x36   : > { %v423_v31 = vld [vmem:[%s1426_s29 + $0x14] sm:$0xff]  ;;  %v421_v33 = vld [vmem:[%s1426_s29 + $0x4] sm:$0xff]  ;;  %v290_v39 = vld [vmem:[%s1426_s29 + $0x20] sm:$0xf]  ;;  %vm329_vm1 = vcmask 1039360   ;;  %vm382_vm2 = vcmask 1031168  }
  0x37   : > { %v272_v14 = vunpack.c.0.s8 %v271_v12  ;;  %v422_v46 = vld [vmem:[%s1426_s29 + $0xc] sm:$0xff]  ;;  %v556_v48 = vld [vmem:[%s1426_s29 + $0x20] sm:$0xff]  ;;  %vm715_vm3 = vcmask 1041408   ;;  %vm711_vm4 = vcmask 31744   ;;  %s1030_s30 = sshll.u32 %s1422_s28, 6  ;;  %s1040_s15 = sshll.u32 %s1258_s21, 3 }
  0x38   : > { %v424_v61 = vld [vmem:[%s1426_s29 + $0x1c] sm:$0xff]  ;;  %s1640_s7 = scalar_lea.vmem [#allocation5], %s1030_s30  ;;  %s1041_s23 = sshll.u32 %s1262_s22, 4 }
  0x39   : > { %1140 = vset.pattern.permute.xlu0 %v1280_v4  ;;  %1142 = vset.pattern.permute.xlu1 %v1281_v5  ;;  %v1443_v16 = vsub.s32 %v272_v14, %v274_v15  ;;  %v425_v15 = vld [vmem:[%s1426_s29 + $0x24] sm:$0xf]  ;;  %s933_s24 = sadd.s32 %s1041_s23, %s1040_s15  ;;  %s937_s13 = sshll.u32 %s1640_s7, 4  ;;  %s1656_s13 = int_to_ptr.vmem [resolvable:$true] %s937_s13 }
  0x3a   : > { %346 = vperm.xlu0 %1140, %v261_v3   ;;  %479 = vperm.xlu1 %1142, %v261_v3   ;;  %s921_s8 = scalar_lea.sflag [#allocation4], %s1422_s28  ;;  %s1178_s16 = scalar_lea.vmem %s1656_s13, 1024 }
  0x3b   : > { %p1179_p8 = scmp.ne.s32.totalorder %s1656_s13, %s1178_s16 }
  0x3d   : > { %p1180_p12 = pnand %p1179_p8, %p1385_p9 }
  0x3e   : > { %1143 = vset.pattern.permute.xlu1 %v1282_v6  ;;  %1144 = vset.pattern.permute.xlu0 %v1283_v7 }
  0x3f   : > { %559 = vperm.xlu1 %1143, %v261_v3   ;;  %611 = vperm.xlu0 %1144, %v261_v3   ;;  %p1181_p0 = pneg %p1180_p12 }
  0x43   : > { %1145 = vset.pattern.permute.xlu1 %v1279_v2  ;;  %1147 = vset.pattern.permute.xlu0 %v1284_v8 }
  0x44   : > { %268 = vperm.xlu1 %1145, %v261_v3   ;;  %535 = vperm.xlu0 %1147, %v261_v3  }
  0x48   : > { %1146 = vset.pattern.permute.xlu1 %v1285_v9  ;;  %1149 = vset.pattern.permute.xlu0 %v1279_v2 }
  0x49   : > { %403 = vperm.xlu1 %1146, %v261_v3  }
  0x4d   : > { %1148 = vset.pattern.permute.xlu1 %v1279_v2 }
  0x4e   : > { %665 = vperm.xlu1 %1148, %v662_v10  }
  0xb0   : > { %v293_v17 = vpop.permute.xlu0 %292  ;;  %v428_v23 = vpop.permute.xlu1 %427 }
  0xb1   : > { %v300_v20 = vrot.slane %v293_v17, %v1443_v16  ;;  %v1460_v30 = vrot.slane %v428_v23, %v1443_v16  ;;  %v557_v23 = vld [vmem:[%s1426_s29 + $0x28] sm:$0xf]  ;;  %s1042_s29 = sshll.u32 %s933_s24, 7 }
  0xb2   : > { %s1654_s14 = scalar_lea.hbm %s1714_s5, %s1042_s29 }
  0xb3   : > { %v303_v21 = vmul.f32 %v300_v20, %v1446_v18  ;;  %v302_v22 = vmul.f32 %v300_v20, %v286_v19  ;;  %v304_v27 = vmul.f32 %v300_v20, %v1452_v24  ;;  %v439_v37 = vmul.f32 %v1460_v30, %v423_v31 }
  0xb4   : > { %v437_v38 = vmul.f32 %v1460_v30, %v421_v33  ;;  %v306_v45 = vmul.f32 %v300_v20, %v290_v39  ;;  %v438_v57 = vmul.f32 %v1460_v30, %v422_v46  ;;  %v305_v3 = vmul.f32 %v300_v20, %v289_v47 }
  0xb5   : > { %314 = vrot.lane.b32.xlu1 %v303_v21, %s1287_s17  ;;  %312 = vrot.lane.b32.xlu0 %v302_v22, %s1287_s17  ;;  %v347_v25 = vpop.permute.xlu0 %346  ;;  %v480_v28 = vpop.permute.xlu1 %479  ;;  %v440_v12 = vmul.f32 %v1460_v30, %v424_v61  ;;  %v441_v17 = vmul.f32 %v1460_v30, %v425_v15 }
  0xb6   : > { %v354_v26 = vrot.slane %v347_v25, %v1443_v16  ;;  %v487_v44 = vrot.slane %v480_v28, %v1443_v16 }
  0xb8   : > { %v356_v29 = vmul.f32 %v354_v26, %v286_v19  ;;  %v357_v32 = vmul.f32 %v354_v26, %v1446_v18  ;;  %v358_v36 = vmul.f32 %v354_v26, %v1452_v24  ;;  %v490_v59 = vmul.f32 %v487_v44, %v422_v46 }
  0xb9   : > { %316 = vrot.lane.b32.xlu0 %v304_v27, %s1287_s17  ;;  %v359_v5 = vmul.f32 %v354_v26, %v289_v47  ;;  %v489_v6 = vmul.f32 %v487_v44, %v421_v33  ;;  %v491_v8 = vmul.f32 %v487_v44, %v423_v31  ;;  %v360_v10 = vmul.f32 %v354_v26, %v290_v39 }
  0xba   : > { %366 = vrot.lane.b32.xlu1 %v356_v29, %s1288_s26  ;;  %v560_v34 = vpop.permute.xlu1 %559  ;;  %v612_v35 = vpop.permute.xlu0 %611  ;;  %v493_v21 = vmul.f32 %v487_v44, %v425_v15  ;;  %v492_v22 = vmul.f32 %v487_v44, %v424_v61 }
  0xbb   : > { %v567_v4 = vrot.slane %v560_v34, %v1443_v16  ;;  %v619_v11 = vrot.slane %v612_v35, %v1443_v16 }
  0xbd   : > { %368 = vrot.lane.b32.xlu0 %v357_v32, %s1288_s26  ;;  %v569_v7 = vmul.f32 %v567_v4, %v1446_v18  ;;  %v571_v9 = vmul.f32 %v567_v4, %v289_v47  ;;  %v570_v13 = vmul.f32 %v567_v4, %v1452_v24  ;;  %v621_v14 = vmul.f32 %v619_v11, %v1446_v18 }
  0xbe   : > { %370 = vrot.lane.b32.xlu1 %v358_v36, %s1288_s26  ;;  %v622_v20 = vmul.f32 %v619_v11, %v1452_v24  ;;  %v572_v25 = vmul.f32 %v567_v4, %v556_v48  ;;  %v625_v26 = vmul.f32 %v619_v11, %v557_v23  ;;  %v624_v27 = vmul.f32 %v619_v11, %v556_v48 }
  0xbf   : > { %v269_v40 = vpop.permute.xlu1 %268  ;;  %v536_v41 = vpop.permute.xlu0 %535 }
  0xc0   : > { %v276_v42 = vrot.slane %v269_v40, %v1443_v16  ;;  %v543_v43 = vrot.slane %v536_v41, %v1443_v16 }
  0xc1   : > { %451 = vrot.lane.b32.xlu0 %v439_v37, %s1287_s17 }
  0xc2   : > { %447 = vrot.lane.b32.xlu1 %v437_v38, %s1287_s17  ;;  %v1481_v49 = vmul.f32 %v1446_v18, %v276_v42  ;;  %v1484_v50 = vmul.f32 %v1452_v24, %v276_v42  ;;  %v1486_v51 = vmul.f32 %v543_v43, %v289_v47  ;;  %v1488_v52 = vmul.f32 %v286_v19, %v276_v42 }
  0xc3   : > { %v1490_v53 = vmul.f32 %v289_v47, %v276_v42  ;;  %v1493_v54 = vmul.f32 %v543_v43, %v1446_v18  ;;  %v1496_v55 = vmul.f32 %v543_v43, %v1452_v24  ;;  %v1498_v56 = vmul.f32 %v556_v48, %v543_v43  ;;  %v705_v24 = vld [vmem:[%s1713_s4] sm:$0xff] }
  0xc4   : > { %v404_v58 = vpop.permute.xlu1 %403  ;;  %v623_v19 = vmul.f32 %v619_v11, %v289_v47  ;;  %v573_v18 = vmul.f32 %v567_v4, %v557_v23 }
  0xc5   : > { %320 = vrot.lane.b32.xlu0 %v306_v45, %s1287_s17  ;;  %v411_v60 = vrot.slane %v404_v58, %v1443_v16 }
  0xc6   : > { %449 = vrot.lane.b32.xlu1 %v438_v57, %s1287_s17 }
  0xc7   : > { %v1505_v62 = vmul.f32 %v421_v33, %v411_v60  ;;  %v1507_v63 = vmul.f32 %v423_v31, %v411_v60  ;;  %v1509_v0 = vmul.f32 %v424_v61, %v411_v60  ;;  %v1511_v1 = vmul.f32 %v422_v46, %v411_v60 }
  0xc9   : > { %501 = vrot.lane.b32.xlu0 %v490_v59, %s1288_s26  ;;  %v1546_v28 = vpop.permute.xlu1 %665 }
  0xca   : > { %318 = vrot.lane.b32.xlu1 %v305_v3, %s1287_s17 }
  0xcd   : > { %372 = vrot.lane.b32.xlu0 %v359_v5, %s1288_s26 }
  0xce   : > { %499 = vrot.lane.b32.xlu1 %v489_v6, %s1288_s26 }
  0xd1   : > { %579 = vrot.lane.b32.xlu0 %v569_v7, %s1287_s17 }
  0xd2   : > { %503 = vrot.lane.b32.xlu1 %v491_v8, %s1288_s26 }
  0xd5   : > { %583 = vrot.lane.b32.xlu0 %v571_v9, %s1287_s17 }
  0xd6   : > { %374 = vrot.lane.b32.xlu1 %v360_v10, %s1288_s26 }
  0xd9   : > { %453 = vrot.lane.b32.xlu0 %v440_v12, %s1287_s17 }
  0xda   : > { %581 = vrot.lane.b32.xlu1 %v570_v13, %s1287_s17 }
  0xdd   : > { %631 = vrot.lane.b32.xlu0 %v621_v14, %s1288_s26 }
  0xde   : > { %455 = vrot.lane.b32.xlu1 %v441_v17, %s1287_s17 }
  0xe1   : > { %635 = vrot.lane.b32.xlu0 %v623_v19, %s1288_s26 }
  0xe2   : > { %633 = vrot.lane.b32.xlu1 %v622_v20, %s1288_s26 }
  0xe5   : > { %507 = vrot.lane.b32.xlu0 %v493_v21, %s1288_s26 }
  0xe6   : > { %505 = vrot.lane.b32.xlu1 %v492_v22, %s1288_s26 }
  0xe9   : > { %587 = vrot.lane.b32.xlu0 %v573_v18, %s1287_s17 }
  0xea   : > { %585 = vrot.lane.b32.xlu1 %v572_v25, %s1287_s17  ;;  %s1289_s17 = smov [#allocation5]  }
  0xed   : > { %639 = vrot.lane.b32.xlu0 %v625_v26, %s1288_s26 }
  0xee   : > { %637 = vrot.lane.b32.xlu1 %v624_v27, %s1288_s26  ;;  %s1182_s26 = sshll.u32 %s1289_s17, 4  ;;  %s1183_s26 = int_to_ptr.vmem [resolvable:$false] %s1182_s26 }
  0xef   : > { %s1184_s27 = scalar_lea.vmem %s1183_s26, 2048  ;;  %p1185_p1 = scmp.lt.s32.totalorder %s1656_s13, %s1183_s26 }
  0xf0   : > { %p1186_p2 = scmp.lt.s32.totalorder %s1184_s27, %s1178_s16 }
  0xf2   : > { %708 = vperm.xlu1 %1148, %v705_v24   ;;  %p1187_p4 = por %p1186_p2, %p1185_p1 }
  0xf4   : > { %p1188_p3 = pnand %p1187_p4, %p1181_p0 }
 0x127   : > { %v315_v29 = vpop.permute.xlu1 %314  ;;  %v313_v30 = vpop.permute.xlu0 %312 }
 0x128   : > { %v323_v31 = vrot.slane %v315_v29, 4  ;;  %v322_v32 = vrot.slane %v313_v30, 4 }
 0x12a   : > { %v328_v34 = vsel %vm327_vm0, %v322_v32, %v323_v31 }
 0x12b   : > { %v317_v33 = vpop.permute.xlu0 %316  ;;  %v330_v38 = vsel %vm329_vm1, %v313_v30, %v328_v34 }
 0x12c   : > { %v324_v35 = vrot.slane %v317_v33, 4  ;;  %v367_v36 = vpop.permute.xlu1 %366  ;;  %v341_v45 = vadd.f32 %v330_v38, %v1488_v52 }
 0x12d   : > { %v376_v41 = vrot.slane %v367_v36, 4 }
 0x12e   : > { %v331_v37 = vsel %vm327_vm0, %v323_v31, %v324_v35 }
 0x12f   : > { %v369_v39 = vpop.permute.xlu0 %368  ;;  %v332_v40 = vsel %vm329_vm1, %v315_v29, %v331_v37 }
 0x130   : > { %v377_v42 = vrot.slane %v369_v39, 4  ;;  %v371_v43 = vpop.permute.xlu1 %370  ;;  %v342_v58 = vadd.f32 %v332_v40, %v1481_v49 }
 0x131   : > { %v378_v44 = vrot.slane %v371_v43, 4 }
 0x132   : > { %v381_v46 = vsel %vm327_vm0, %v376_v41, %v377_v42 }
 0x133   : > { %v383_v47 = vsel %vm382_vm2, %v367_v36, %v381_v46  ;;  %v384_v48 = vsel %vm327_vm0, %v377_v42, %v378_v44  ;;  %v1556_v57 = vpop.permute.xlu0 %451 }
 0x134   : > { %v448_v59 = vpop.permute.xlu1 %447  ;;  %v385_v60 = vsel %vm382_vm2, %v369_v39, %v384_v48  ;;  %v394_v61 = vadd.f32 %v383_v47, %v341_v45  ;;  %v459_v49 = vrot.slane %v1556_v57, 4 }
 0x135   : > { %v395_v3 = vadd.f32 %v385_v60, %v342_v58  ;;  %v457_v8 = vrot.slane %v448_v59, 4 }
 0x136   : > { %v417_v4 = vadd.f32 %v1505_v62, %v394_v61 }
 0x137   : > { %v321_v5 = vpop.permute.xlu0 %320  ;;  %v418_v52 = vadd.f32 %v1511_v1, %v395_v3 }
 0x138   : > { %v450_v6 = vpop.permute.xlu1 %449  ;;  %v326_v18 = vrot.slane %v321_v5, 4 }
 0x139   : > { %v458_v7 = vrot.slane %v450_v6, 4 }
 0x13b   : > { %v502_v9 = vpop.permute.xlu0 %501  ;;  %v462_v11 = vsel %vm327_vm0, %v457_v8, %v458_v7  ;;  %v464_v1 = vsel %vm327_vm0, %v458_v7, %v459_v49 }
 0x13c   : > { %v319_v10 = vpop.permute.xlu1 %318  ;;  %v463_v62 = vsel %vm329_vm1, %v448_v59, %v462_v11  ;;  %v510_v20 = vrot.slane %v502_v9, 4  ;;  %v465_v29 = vsel %vm329_vm1, %v450_v6, %v464_v1 }
 0x13d   : > { %v325_v12 = vrot.slane %v319_v10, 4  ;;  %v474_v26 = vadd.f32 %v463_v62, %v417_v4  ;;  %v475_v36 = vadd.f32 %v465_v29, %v418_v52 }
 0x13f   : > { %v333_v13 = vsel %vm327_vm0, %v324_v35, %v325_v12  ;;  %v373_v14 = vpop.permute.xlu0 %372 }
 0x140   : > { %v334_v15 = vsel %vm329_vm1, %v317_v33, %v333_v13  ;;  %v379_v17 = vrot.slane %v373_v14, 4  ;;  %v500_v19 = vpop.permute.xlu1 %499  ;;  %v335_v33 = vsel %vm327_vm0, %v325_v12, %v326_v18 }
 0x141   : > { %v343_v21 = vadd.f32 %v334_v15, %v1484_v50  ;;  %v509_v22 = vrot.slane %v500_v19, 4  ;;  %v336_v40 = vsel %vm329_vm1, %v319_v10, %v335_v33 }
 0x142   : > { %v386_v23 = vsel %vm327_vm0, %v378_v44, %v379_v17  ;;  %v344_v45 = vadd.f32 %v336_v40, %v1490_v53 }
 0x143   : > { %v387_v25 = vsel %vm382_vm2, %v371_v43, %v386_v23  ;;  %v514_v27 = vsel %vm327_vm0, %v509_v22, %v510_v20  ;;  %v580_v24 = vpop.permute.xlu0 %579 }
 0x144   : > { %v396_v30 = vadd.f32 %v387_v25, %v343_v21  ;;  %v515_v31 = vsel %vm382_vm2, %v500_v19, %v514_v27  ;;  %v1574_v32 = vpop.permute.xlu1 %503  ;;  %v589_v61 = vrot.slane %v580_v24, 4  ;;  %v673_v25 = vrot.slane %v1546_v28, %v1443_v16 }
 0x145   : > { %v526_v50 = vadd.f32 %v515_v31, %v474_v26  ;;  %v511_v34 = vrot.slane %v1574_v32, 4 }
 0x146   : > { %v419_v35 = vadd.f32 %v1507_v63, %v396_v30 }
 0x147   : > { %v549_v37 = vadd.f32 %v1493_v54, %v526_v50  ;;  %v516_v38 = vsel %vm327_vm0, %v510_v20, %v511_v34  ;;  %v1581_v39 = vpop.permute.xlu0 %583 }
 0x148   : > { %v375_v41 = vpop.permute.xlu1 %374  ;;  %v517_v42 = vsel %vm382_vm2, %v502_v9, %v516_v38  ;;  %v591_v60 = vrot.slane %v1581_v39, 4 }
 0x149   : > { %v380_v43 = vrot.slane %v375_v41, 4  ;;  %v527_v44 = vadd.f32 %v517_v42, %v475_v36 }
 0x14b   : > { %v388_v46 = vsel %vm327_vm0, %v379_v17, %v380_v43  ;;  %v454_v47 = vpop.permute.xlu0 %453  ;;  %v550_v63 = vadd.f32 %v1496_v55, %v527_v44 }
 0x14c   : > { %v389_v54 = vsel %vm382_vm2, %v373_v14, %v388_v46  ;;  %v582_v48 = vpop.permute.xlu1 %581  ;;  %v460_v3 = vrot.slane %v454_v47, 4 }
 0x14d   : > { %v397_v58 = vadd.f32 %v389_v54, %v344_v45  ;;  %v590_v59 = vrot.slane %v582_v48, 4 }
 0x14e   : > { %v466_v55 = vsel %vm327_vm0, %v459_v49, %v460_v3 }
 0x14f   : > { %v632_v4 = vpop.permute.xlu0 %631  ;;  %v420_v5 = vadd.f32 %v1509_v0, %v397_v58  ;;  %v596_v52 = vsel %vm327_vm0, %v590_v59, %v591_v60  ;;  %v594_v6 = vsel %vm327_vm0, %v589_v61, %v590_v59  ;;  %v467_v0 = vsel %vm329_vm1, %v1556_v57, %v466_v55 }
 0x150   : > { %v456_v53 = vpop.permute.xlu1 %455  ;;  %v597_v8 = vsel %vm329_vm1, %v582_v48, %v596_v52  ;;  %v595_v10 = vsel %vm329_vm1, %v580_v24, %v594_v6  ;;  %v641_v14 = vrot.slane %v632_v4, 4  ;;  %v476_v24 = vadd.f32 %v467_v0, %v419_v35 }
 0x151   : > { %v461_v7 = vrot.slane %v456_v53, 4  ;;  %v607_v17 = vadd.f32 %v597_v8, %v550_v63  ;;  %v606_v20 = vadd.f32 %v595_v10, %v549_v37 }
 0x153   : > { %v636_v9 = vpop.permute.xlu0 %635  ;;  %v468_v11 = vsel %vm327_vm0, %v460_v3, %v461_v7 }
 0x154   : > { %v643_v12 = vrot.slane %v636_v9, 4  ;;  %v634_v13 = vpop.permute.xlu1 %633  ;;  %v469_v1 = vsel %vm329_vm1, %v454_v47, %v468_v11 }
 0x155   : > { %v642_v15 = vrot.slane %v634_v13, 4  ;;  %v477_v29 = vadd.f32 %v469_v1, %v420_v5 }
 0x157   : > { %v646_v62 = vsel %vm327_vm0, %v641_v14, %v642_v15  ;;  %v648_v19 = vsel %vm327_vm0, %v642_v15, %v643_v12  ;;  %v508_v49 = vpop.permute.xlu0 %507 }
 0x158   : > { %v649_v21 = vsel %vm382_vm2, %v634_v13, %v648_v19  ;;  %v513_v22 = vrot.slane %v508_v49, 4  ;;  %v506_v23 = vpop.permute.xlu1 %505  ;;  %v647_v18 = vsel %vm382_vm2, %v632_v4, %v646_v62 }
 0x159   : > { %v659_v26 = vadd.f32 %v649_v21, %v607_v17  ;;  %v512_v57 = vrot.slane %v506_v23, 4  ;;  %v658_v27 = vadd.f32 %v647_v18, %v606_v20 }
 0x15b   : > { %v518_v30 = vsel %vm327_vm0, %v511_v34, %v512_v57  ;;  %v520_v31 = vsel %vm327_vm0, %v512_v57, %v513_v22  ;;  %v588_v33 = vpop.permute.xlu0 %587  ;;  %v675_v50 = vadd.f32 %v673_v25, %v658_v27  ;;  %v676_v36 = vadd.f32 %v673_v25, %v659_v26 }
 0x15c   : > { %v519_v37 = vsel %vm382_vm2, %v1574_v32, %v518_v30  ;;  %v521_v38 = vsel %vm382_vm2, %v506_v23, %v520_v31  ;;  %v593_v40 = vrot.slane %v588_v33, 4  ;;  %v586_v41 = vpop.permute.xlu1 %585 }
 0x15d   : > { %v528_v16 = vadd.f32 %v519_v37, %v476_v24  ;;  %v529_v28 = vadd.f32 %v521_v38, %v477_v29  ;;  %v592_v42 = vrot.slane %v586_v41, 4  ;;  %v679_v43 = vmax.f32 %v675_v50, 0.0 }
 0x15e   : > { %v680_v35 = vmax.f32 %v676_v36, 0.0 }
 0x15f   : > { %v551_v44 = vadd.f32 %v1486_v51, %v528_v16  ;;  %v552_v34 = vadd.f32 %v1498_v56, %v529_v28  ;;  %v598_v45 = vsel %vm327_vm0, %v591_v60, %v592_v42  ;;  %v600_v46 = vsel %vm327_vm0, %v592_v42, %v593_v40  ;;  %v640_v47 = vpop.permute.xlu0 %639  ;;  %v683_v51 = vld [vmem:[%s1712_s3] sm:$0xff] }
 0x160   : > { %v599_v32 = vsel %vm329_vm1, %v1581_v39, %v598_v45  ;;  %v601_v63 = vsel %vm329_vm1, %v586_v41, %v600_v46  ;;  %v645_v54 = vrot.slane %v640_v47, 4  ;;  %v638_v48 = vpop.permute.xlu1 %637  ;;  %v689_v58 = vcombine.high %v679_v43, %v679_v43 }
 0x161   : > { %v644_v59 = vrot.slane %v638_v48, 4  ;;  %v690_v61 = vcombine.high %v680_v35, %v680_v35  ;;  %v608_v56 = vadd.f32 %v599_v32, %v551_v44  ;;  %v697_v3 = vpack.c.bf16 %v679_v43, %v679_v43 }
 0x162   : > { %v698_v60 = vpack.c.bf16 %v689_v58, %v689_v58  ;;  %v699_v4 = vpack.c.bf16 %v680_v35, %v680_v35  ;;  %v609_v5 = vadd.f32 %v601_v63, %v552_v34  ;;  %v684_v8 = vpack.c.bf16 %v683_v51, %v683_v51 }
 0x163   : > { %v650_v52 = vsel %vm327_vm0, %v643_v12, %v644_v59  ;;  %v652_v39 = vsel %vm327_vm0, %v644_v59, %v645_v54  ;;  %v700_v53 = vpack.c.bf16 %v690_v61, %v690_v61  ;;  %v717_v55 = vsel %vm715_vm3, %v697_v3, 0 }
 0x164   : > { %v651_v6 = vsel %vm382_vm2, %v636_v9, %v650_v52  ;;  %v653_v7 = vsel %vm382_vm2, %v638_v48, %v652_v39  ;;  %1031 = vmatprep.subr.msk.bf16.mxu0 %vm715_vm3, %v698_v60  ;;  %v723_v13 = vsel %vm715_vm3, %v699_v4, 0 }
 0x165   : > { %v660_v10 = vadd.f32 %v651_v6, %v608_v56  ;;  %v661_v11 = vadd.f32 %v653_v7, %v609_v5  ;;  %1033 = vmatprep.subr.msk.bf16.mxu1 %vm715_vm3, %v700_v53  ;;  %755 = vmatpush1.bf16.msra.mxu0 %v717_v55 }
 0x166   : > { %796 = vmatpush1.bf16.msra.mxu1 %v723_v13 }
 0x167   : > { %v678_v12 = vadd.f32 %v673_v25, %v661_v11  ;;  %v677_v14 = vadd.f32 %v673_v25, %v660_v10 }
 0x168   : > { %1032 = vmatmul.mubr.msk.bf16.vlgmr.msra.gmra.mxu0 %vm711_vm4, %v684_v8 }
 0x169   : > { %v682_v9 = vmax.f32 %v678_v12, 0.0  ;;  %1034 = vmatmul.mubr.msk.bf16.vlgmr.msra.gmra.mxu1 %vm711_vm4, %v684_v8  ;;  %v681_v15 = vmax.f32 %v677_v14, 0.0  ;;  %854 = vmatprep.mubr.bf16.mxu0 %v1279_v2 }
 0x16a   : > { %895 = vmatprep.mubr.bf16.mxu1 %v1279_v2 }
 0x16b   : > { %v692_v0 = vcombine.high %v682_v9, %v682_v9  ;;  %v691_v17 = vcombine.high %v681_v15, %v681_v15  ;;  %v701_v62 = vpack.c.bf16 %v681_v15, %v681_v15  ;;  %v703_v19 = vpack.c.bf16 %v682_v9, %v682_v9 }
 0x16d   : > { %v702_v49 = vpack.c.bf16 %v691_v17, %v691_v17  ;;  %v704_v1 = vpack.c.bf16 %v692_v0, %v692_v0  ;;  %v729_v20 = vsel %vm715_vm3, %v701_v62, 0  ;;  %v735_v21 = vsel %vm715_vm3, %v703_v19, 0  ;;  %v709_v2 = vpop.permute.xlu1 %708 }
 0x16f   : > { %1035 = vmatprep.subr.msk.bf16.mxu0 %vm715_vm3, %v702_v49  ;;  %1037 = vmatprep.subr.msk.bf16.mxu1 %vm715_vm3, %v704_v1 }
 0x170   : > { %837 = vmatpush1.bf16.msra.mxu0 %v729_v20  ;;  %878 = vmatpush1.bf16.msra.mxu1 %v735_v21 }
 0x173   : > { %1036 = vmatmul.mubr.msk.bf16.vlgmr.msra.gmra.mxu0 %vm711_vm4, %v684_v8  ;;  %1038 = vmatmul.mubr.msk.bf16.vlgmr.msra.gmra.mxu1 %vm711_vm4, %v684_v8 }
 0x228   : > { %v774_v22 = vpop.f32.mrf.mxu0 }
 0x229   : > { %v775_v23 = vadd.f32 %v774_v22, %v709_v2  ;;  %v815_v18 = vpop.f32.mrf.mxu1 }
 0x22a   : > { %v816_v25 = vadd.f32 %v815_v18, %v709_v2  ;;  %v776_v26 = vpop.f32.mrf.mxu0 }
 0x22b   : > { %v904_v57 = vmax.f32 %v775_v23, 0.0  ;;  %v777_v27 = vadd.f32 %v776_v26, %v709_v2  ;;  %v817_v24 = vpop.f32.mrf.mxu1 }
 0x22c   : > { %v906_v29 = vmax.f32 %v816_v25, 0.0  ;;  %v818_v30 = vadd.f32 %v817_v24, %v709_v2  ;;  %v778_v31 = vpop.f32.mrf.mxu0 }
 0x22d   : > { %912 = vst [vmem:[%s1640_s7] sm:$0xff] %v904_v57  ;;  %v905_v33 = vmax.f32 %v777_v27, 0.0  ;;  %v819_v50 = vpop.f32.mrf.mxu1 }
 0x22e   : > { %914 = vst [vmem:[%s1640_s7 + $0x10] sm:$0xff] %v906_v29  ;;  %v907_v36 = vmax.f32 %v818_v30, 0.0  ;;  %v779_v37 = vpop.f32.mrf.mxu0 }
 0x22f   : > { %913 = vst [vmem:[%s1640_s7 + $0x8] sm:$0xff] %v905_v33  ;;  %v820_v38 = vpop.f32.mrf.mxu1 }
 0x230   : > { %915 = vst [vmem:[%s1640_s7 + $0x18] sm:$0xff] %v907_v36 }
 0x233   : > { %v856_v40 = vpop.f32.mrf.mxu0  ;;  %v897_v41 = vpop.f32.mrf.mxu1 }
 0x234   : > { %v857_v16 = vadd.f32 %v856_v40, %v709_v2  ;;  %v898_v28 = vadd.f32 %v897_v41, %v709_v2 }
 0x235   : > { %v858_v42 = vpop.f32.mrf.mxu0  ;;  %v899_v43 = vpop.f32.mrf.mxu1 }
 0x236   : > { %v908_v35 = vmax.f32 %v857_v16, 0.0  ;;  %v910_v44 = vmax.f32 %v898_v28, 0.0  ;;  %v859_v34 = vadd.f32 %v858_v42, %v709_v2  ;;  %v900_v45 = vadd.f32 %v899_v43, %v709_v2 }
 0x237   : > { %v860_v46 = vpop.f32.mrf.mxu0  ;;  %v901_v47 = vpop.f32.mrf.mxu1 }
 0x238   : > { %916 = vst [vmem:[%s1640_s7 + $0x20] sm:$0xff] %v908_v35  ;;  %918 = vst [vmem:[%s1640_s7 + $0x30] sm:$0xff] %v910_v44  ;;  %v909_v32 = vmax.f32 %v859_v34, 0.0  ;;  %v911_v63 = vmax.f32 %v900_v45, 0.0 }
 0x239   : > { %v861_v54 = vpop.f32.mrf.mxu0  ;;  %v902_v48 = vpop.f32.mrf.mxu1 }
 0x23a   : > { %917 = vst [vmem:[%s1640_s7 + $0x28] sm:$0xff] %v909_v32  ;;  %919 = vst [vmem:[%s1640_s7 + $0x38] sm:$0xff] %v911_v63 }
 0x23b   : > { %1191 = shalt.err (!%p1188_p3)
}
 0x23c   : > { %s1192_s6 = scalar_lea.hbm %s1654_s14, 1024  ;;  %s1196_s11 = scalar_lea.hbm %s1714_s5, 4096 }
 0x23d   : > { %p1193_p5 = scmp.ne.s32.totalorder %s1654_s14, %s1192_s6  ;;  %p1197_p10 = scmp.lt.s32.totalorder %s1654_s14, %s1714_s5 }
 0x23e   : > { %p1198_p11 = scmp.lt.s32.totalorder %s1196_s11, %s1192_s6 }
 0x23f   : > { %p1194_p6 = pnand %p1193_p5, %p1385_p9 }
 0x240   : > { %p1199_p13 = por %p1198_p11, %p1197_p10 }
 0x241   : > { %p1195_p7 = pneg %p1194_p6 }
 0x243   : > { %p1200_p8 = pnand %p1199_p13, %p1195_p7 }
 0x245   : > { %1203 = shalt.err (!%p1200_p8)
}
 0x246   : > { %1051 = dma.vmem_to_hbm [thread:$0]  (%p1385_p9), %s1656_s13, 1024, %s1654_s14, %s921_s8  }
 0x247 PF: > { %p1062_p12 = scmp.ge.s32.totalorder %s1274_s25, 2  ;;  %s949_s15 = sand.u32 1, %s1246_s18  }
 0x248   : > { %p1729_p0 = scmp.ne.s32.totalorder %s1726_s12, 0  ;;  %s950_s23 = scalar_lea.sflag [#allocation4], %s949_s15 }
 0x24a   : > { %p1058_p1 = pnand %p1062_p12, %p1729_p0 }
 0x24c   : > { %p1059_p2 = pneg %p1058_p1 }
 0x24e   : > { %1241 = dma.done.wait (%p1059_p2), %s950_s23, 1024  }
 0x24f   : > { %1243 = vsyncadd (%p1059_p2), %s950_s23, 4294966272  ;;  %s21_s25 = sadd.s32 1, %s1274_s25   ;;  %s1730_s9 = sld [smem:[#allocation12_spill]] }
 0x250   : > { %p18_p4 = scmp.ge.s32.totalorder %s21_s25, 6   ;;  %s1731_s21 = sld [smem:[#allocation8_spill]] }
 0x251   : > { %s1732_s22 = sld [smem:[#allocation9_spill]]  ;;  %s1735_s18 = smov %s1250_s19 }
 0x252   : > { %s1733_s23 = sld [smem:[#allocation10_spill]]  ;;  %s1736_s19 = smov %s1254_s20 }
 0x253   : > { %s1734_s24 = sld [smem:[#allocation11_spill]]  ;;  %20 = sbr.rel (!%p18_p4) target bundleno = 7 (0x7), region = 85 }
 0x255   : > { %s1737_s20 = smov %s1730_s9 }
 0x258   :  { %955 = vsyncpa [#allocation3], 1 }
 0x259   :  { %957 = vsyncpa [#allocation3 + $0x1], 1 }
 0x25a   :  { %958 = vsyncpa [#allocation4], 1 }
 0x25b   :  { %960 = vsyncpa [#allocation4 + $0x1], 1 }

</bundles_post_ra>
